<compile_context>
chip_gen: v6e
topology: v6e:2x2x1
jax: 0.10.0
libtpu: 0.0.40
codegen_flags: <defaults>
</compile_context>

<pallas_src>
import functools

import jax
import jax.numpy as jnp
from jax.experimental import pallas as pl
from jax.experimental.pallas import tpu as pltpu

LAMB = 0.9
BN_EPS = 1e-5

_VMEM = pl.BlockSpec(memory_space=pltpu.MemorySpace.VMEM)


# ----------------------- small fused RCDIP linear algebra -----------------------

def _tmp_uv_kernel(u_ref, v_ref, noi_ref, o_ref, *, lamb):
    # tmp_uv = lamb * U @ V^T + (1 - lamb) * noi_mat      (A @ B^T via trans-b dot)
    uv_t = jax.lax.dot_general(u_ref[...], v_ref[...],
                               (((1,), (1,)), ((), ())),
                               preferred_element_type=jnp.float32)
    o_ref[...] = lamb * uv_t + (1.0 - lamb) * noi_ref[...]


def _v_matu_kernel(u_ref, vt_ref, tmp_ref, v_out_ref, matu_ref):
    # V = u @ vt ; MatU = tmp_uv @ V     (fused post-SVD kernel)
    V = jnp.dot(u_ref[...], vt_ref[...], preferred_element_type=jnp.float32)
    v_out_ref[...] = V
    matu_ref[...] = jnp.dot(tmp_ref[...], V, preferred_element_type=jnp.float32)


def _finalize_kernel(matu_ref, noiseu_ref, v_ref, clnu_ref, clean_ref):
    # ClnU = MatU - noiseU ; cleanUV = ClnU @ V^T  (trans-b dot, no glue transpose)
    cln = matu_ref[...] - noiseu_ref[...]
    clnu_ref[...] = cln
    clean_ref[...] = jax.lax.dot_general(cln, v_ref[...],
                                         (((1,), (1,)), ((), ())),
                                         preferred_element_type=jnp.float32)


def fused_tmp_uv(initU, initV, noi_mat, lamb):
    us1 = initU.shape[0]
    vs1 = initV.shape[0]
    return pl.pallas_call(
        functools.partial(_tmp_uv_kernel, lamb=lamb),
        out_shape=jax.ShapeDtypeStruct((us1, vs1), jnp.float32),
        in_specs=[_VMEM, _VMEM, _VMEM],
        out_specs=_VMEM,
    )(initU, initV, noi_mat)


def fused_v_matu(u, vt, tmp_uv):
    vs1, r = u.shape
    us1 = tmp_uv.shape[0]
    return pl.pallas_call(
        _v_matu_kernel,
        out_shape=(jax.ShapeDtypeStruct((vs1, r), jnp.float32),
                   jax.ShapeDtypeStruct((us1, r), jnp.float32)),
        in_specs=[_VMEM, _VMEM, _VMEM],
        out_specs=(_VMEM, _VMEM),
    )(u, vt, tmp_uv)


def fused_finalize(MatU, noiseU, V):
    us1, r = MatU.shape
    vs1 = V.shape[0]
    return pl.pallas_call(
        _finalize_kernel,
        out_shape=(jax.ShapeDtypeStruct((us1, r), jnp.float32),
                   jax.ShapeDtypeStruct((us1, vs1), jnp.float32)),
        in_specs=[_VMEM, _VMEM, _VMEM],
        out_specs=(_VMEM, _VMEM),
    )(MatU, noiseU, V)


# ----------------------- fused, batched DnCNN Pallas kernel -----------------------

def make_dncnn_kernel(layer_cfgs, H, W, eps=BN_EPS):
    """Builds a kernel running the whole DnCNN on one image per grid step.

    layer_cfgs: tuple of (use_bn, use_relu) per conv layer (structure is static).
    Inputs (in order): image (1,1,H*W), then per layer: w (+ gamma, beta if BN).
    Output: denoised image (1,1,H*W).
    """
    HW = H * W
    taps = [(dh, dw) for dh in (-1, 0, 1) for dw in (-1, 0, 1)]  # == (kh, kw) row-major

    def kernel(*refs):
        x_ref = refs[0]
        out_ref = refs[-1]
        idx = 1
        layer_refs = []
        for (use_bn, use_relu) in layer_cfgs:
            w_ref = refs[idx]; idx += 1
            if use_bn:
                g_ref, b_ref = refs[idx], refs[idx + 1]; idx += 2
            else:
                g_ref = b_ref = None
            layer_refs.append((w_ref, g_ref, b_ref, use_bn, use_relu))

        # Zero-padding boundary masks for the 9 taps (hoisted, computed once).
        p = jax.lax.broadcasted_iota(jnp.int32, (1, HW), 1)
        hh = p // W
        ww = p % W
        masks = []
        for dh, dw in taps:
            masks.append((hh + dh >= 0) & (hh + dh < H) &
                         (ww + dw >= 0) & (ww + dw < W))

        def im2col(x):
            # x: (Cin, HW) f32 -> (9*Cin, HW) bf16.  Shifts live on the lane axis
            # (pltpu.roll -> XLU), masks implement padding=1, concat is sublane-wise.
            parts = []
            for t, (dh, dw) in enumerate(taps):
                if dh == 0 and dw == 0:
                    xs = x
                else:
                    off = dh * W + dw
                    xs = pltpu.roll(x, (-off) % HW, 1)
                    xs = jnp.where(masks[t], xs, 0.0)
                parts.append(xs.astype(jnp.bfloat16))
            return jnp.concatenate(parts, axis=0)

        x = x_ref[...].reshape(1, HW).astype(jnp.float32)       # (Cin=1, HW)
        for (w_ref, g_ref, b_ref, use_bn, use_relu) in layer_refs:
            xtap = im2col(x)                                    # (9*Cin, HW) bf16
            # Single large-K MXU dot: (Cout, 9*Cin) @ (9*Cin, HW) -> (Cout, HW)
            acc = jnp.dot(w_ref[...], xtap, preferred_element_type=jnp.float32)
            if use_bn:
                # Training-mode BatchNorm2d on a batch of 1: per-channel stats
                # over H*W, one pass (var = E[x^2] - E[x]^2), affine gamma/beta.
                mu = jnp.mean(acc, axis=1, keepdims=True)
                ms = jnp.mean(acc * acc, axis=1, keepdims=True)
                var = ms - mu * mu
                acc = (acc - mu) * (jax.lax.rsqrt(var + eps) * g_ref[...]) + b_ref[...]
            if use_relu:
                acc = jnp.maximum(acc, 0.0)
            x = acc
        out_ref[...] = x.reshape(out_ref.shape)

    return kernel


def dncnn_forward_all(layers, images_r1hw, Hei, Wid):
    """Run the DnCNN on all r images in one pallas_call (grid over r)."""
    r = images_r1hw.shape[0]
    HW = Hei * Wid
    inputs = [images_r1hw]
    in_specs = [pl.BlockSpec((1, 1, HW), lambda i: (i, 0, 0))]
    cfgs = []
    for lyr in layers:
        inputs.append(lyr["w"])
        in_specs.append(pl.BlockSpec(lyr["w"].shape, lambda i: (0, 0)))
        if lyr["use_bn"]:
            inputs += [lyr["gamma"], lyr["beta"]]
            in_specs += [pl.BlockSpec(lyr["gamma"].shape, lambda i: (0, 0)),
                         pl.BlockSpec(lyr["beta"].shape, lambda i: (0, 0))]
        cfgs.append((lyr["use_bn"], lyr["use_relu"]))

    kernel = make_dncnn_kernel(tuple(cfgs), Hei, Wid)
    # TODO(synk): for large images add halo-tiled H blocking (v7x has only 64 MiB
    # VMEM); the whole-image-in-VMEM path here is sized for small demo images.
    out = pl.pallas_call(
        kernel,
        out_shape=jax.ShapeDtypeStruct((r, 1, HW), jnp.float32),
        grid=(r,),
        in_specs=in_specs,
        out_specs=pl.BlockSpec((1, 1, HW), lambda i: (i, 0, 0)),
        compiler_params=pltpu.CompilerParams(dimension_semantics=("parallel",)),
    )(*inputs)
    return out.reshape(r, HW)


# ----------------------------- DnCNN parameters -----------------------------

def torch_conv_weight_to_k(w_oihw):
    # PyTorch (Cout, Cin, 3, 3) -> (Cout, 9*Cin) with K index = (kh*3+kw)*Cin + ci,
    # matching the tap stacking order used by im2col() above (cross-correlation).
    co, ci, kh, kw = w_oihw.shape
    return jnp.transpose(w_oihw, (0, 2, 3, 1)).reshape(co, kh * kw * ci)


def init_dncnn(key, number_layer, features=64):
    """Synthetic parameters matching DnCNN(channels=1, num_of_layers): conv bias=False,
    fresh BatchNorm2d affine (gamma=1, beta=0). Weights stored bf16 for the MXU."""
    layers = []
    key, sub = jax.random.split(key)
    w = jax.random.normal(sub, (features, 1, 3, 3), jnp.float32) * 0.05
    layers.append(dict(w=torch_conv_weight_to_k(w).astype(jnp.bfloat16),
                       gamma=None, beta=None, use_bn=False, use_relu=True))
    for _ in range(number_layer - 2):
        key, sub = jax.random.split(key)
        w = jax.random.normal(sub, (features, features, 3, 3), jnp.float32) * 0.02
        layers.append(dict(w=torch_conv_weight_to_k(w).astype(jnp.bfloat16),
                           gamma=jnp.ones((features, 1), jnp.float32),
                           beta=jnp.zeros((features, 1), jnp.float32),
                           use_bn=True, use_relu=True))
    key, sub = jax.random.split(key)
    w = jax.random.normal(sub, (1, features, 3, 3), jnp.float32) * 0.02
    layers.append(dict(w=torch_conv_weight_to_k(w).astype(jnp.bfloat16),
                       gamma=None, beta=None, use_bn=False, use_relu=False))
    return layers


# ----------------------------- RCDIP forward -----------------------------

def rcdip_forward(nets, noi_mat, initU, initV, Hei, Wid, order, lamb=LAMB):
    us1, r = initU.shape
    # tmp_uv = lamb * U @ V^T + (1 - lamb) * noi_mat        (Pallas, fused)
    tmp_uv = fused_tmp_uv(initU, initV, noi_mat, lamb)                  # (us1, vs1)
    # TODO(synk): torch.linalg.svd has no Pallas equivalent; the tiny (vs1 x r)
    # product feeding it and the SVD itself stay in XLA.
    m_small = jnp.matmul(tmp_uv.T, initU)                               # (vs1, r)
    u, _, vt = jnp.linalg.svd(m_small, full_matrices=False)
    # V = u @ vt ; MatU = tmp_uv @ V                        (Pallas, fused)
    V, MatU = fused_v_matu(u, vt, tmp_uv)                               # (vs1,r),(us1,r)
    # Batched DnCNN over all r columns in one fused Pallas kernel.
    images = MatU.T.reshape(r, 1, Hei * Wid)                            # lane-dense rows
    noiseU_rows = dncnn_forward_all(nets[order], images, Hei, Wid)      # (r, us1)
    noiseU = noiseU_rows.T                                              # (us1, r) layout plumbing
    # ClnU = MatU - noiseU ; cleanUV = ClnU @ V^T           (Pallas, fused)
    ClnU, cleanUV = fused_finalize(MatU, noiseU, V)
    return cleanUV, ClnU, V


# ----------------------------- demo -----------------------------

if __name__ == "__main__":
    key = jax.random.PRNGKey(0)

    Hei, Wid = 16, 16
    us1 = Hei * Wid          # 256
    vs1 = 8
    r = 4
    iters = 2                # small RCDIP config for the demo
    number_layer = 4
    order = 1

    k_noi, k_u, k_v, k_net = jax.random.split(key, 4)
    noi_mat = jax.random.normal(k_noi, (us1, vs1), jnp.float32)
    initU = jax.random.normal(k_u, (us1, r), jnp.float32)
    initV = jax.random.normal(k_v, (vs1, r), jnp.float32)

    net_keys = jax.random.split(k_net, iters)
    nets = [init_dncnn(net_keys[i], number_layer) for i in range(iters)]

    cleanUV, ClnU, V = rcdip_forward(nets, noi_mat, initU, initV, Hei, Wid, order)
    jax.block_until_ready((cleanUV, ClnU, V))

    assert cleanUV.shape == (us1, vs1)
    assert ClnU.shape == (us1, r)
    assert V.shape == (vs1, r)
    assert bool(jnp.all(jnp.isfinite(cleanUV)))
    print("KERNEL_OK")
</pallas_src>

<mosaic_0001>
module attributes {stable_mosaic.version = 11 : i64} {
  func.func @_tmp_uv_kernel(%arg0: memref<256x4xf32, #tpu.memory_space<vmem>>, %arg1: memref<8x4xf32, #tpu.memory_space<vmem>>, %arg2: memref<256x8xf32, #tpu.memory_space<vmem>>, %arg3: memref<256x8xf32, #tpu.memory_space<vmem>>) attributes {dimension_semantics = [], scalar_prefetch = 0 : i64, scratch_operands = 0 : i64, tpu.core_type = #tpu.core_type<tc>} {
    %c0 = arith.constant 0 : index
    %c0_0 = arith.constant 0 : index
    %0 = vector.load %arg0[%c0, %c0_0] : memref<256x4xf32, #tpu.memory_space<vmem>>, vector<256x4xf32>
    %c0_1 = arith.constant 0 : index
    %c0_2 = arith.constant 0 : index
    %1 = vector.load %arg1[%c0_1, %c0_2] : memref<8x4xf32, #tpu.memory_space<vmem>>, vector<8x4xf32>
    %cst = arith.constant dense<0.000000e+00> : vector<256x8xf32>
    %2 = tpu.matmul %0, %1, %cst {dimension_numbers = #tpu.dot_dimension_numbers<[1], [1], [0], [0], [0, 0, 1, 0], [], []>} : vector<256x4xf32>, vector<8x4xf32>, vector<256x8xf32> -> vector<256x8xf32>
    %cst_3 = arith.constant 0.899999976 : f32
    %3 = vector.broadcast %cst_3 : f32 to vector<256x8xf32>
    %4 = arith.mulf %3, %2 : vector<256x8xf32>
    %c0_4 = arith.constant 0 : index
    %c0_5 = arith.constant 0 : index
    %5 = vector.load %arg2[%c0_4, %c0_5] : memref<256x8xf32, #tpu.memory_space<vmem>>, vector<256x8xf32>
    %cst_6 = arith.constant 1.000000e-01 : f32
    %6 = vector.broadcast %cst_6 : f32 to vector<256x8xf32>
    %7 = arith.mulf %6, %5 : vector<256x8xf32>
    %8 = arith.addf %4, %7 : vector<256x8xf32>
    %c0_7 = arith.constant 0 : index
    %c0_8 = arith.constant 0 : index
    %9 = vector.load %arg3[%c0_7, %c0_8] : memref<256x8xf32, #tpu.memory_space<vmem>>, vector<256x8xf32>
    tpu.vector_store %arg3[%c0_7, %c0_8], %8 {strides = array<i32>} : memref<256x8xf32, #tpu.memory_space<vmem>>, vector<256x8xf32>,
    return
  }
}

</mosaic_0001>

<bundles_post_ra>
// kernel: tpu_custom_call.1
= control target key start
LH: loop header
LB: loop body
LE: loop exit
PB: predicated region body
PF: predicated region fallthrough
CT: control target
= control target key end

     0   :  { %vm47_vm0 = vcmask 31744   ;;  %vm500_vm1 = vcmask 64512   ;;  %s1034_s1 = inlined_call_operand.vmem [shape: f32[8,4], index: 1, kind: input, shape index: {}]   ;;  %s1035_s0 = inlined_call_operand.vmem [shape: f32[256,4], index: 0, kind: input, shape index: {}]   ;;  %s1036_s2 = inlined_call_operand.vmem [shape: f32[256,8], index: 2, kind: input, shape index: {}]   ;;  %s1037_s3 = inlined_call_operand.vmem [shape: f32[256,8], index: 3, kind: output, shape index: {}]  }
   0x1   :  { %v46_v0 = vld [vmem:[%s1034_s1] sm:$0xff]  ;;  %v15_v3 = vld [vmem:[%s1035_s0 + $0x8] sm:$0xff]  ;;  %v16_v5 = vld [vmem:[%s1035_s0 + $0x10] sm:$0xff] }
   0x2   :  { %v14_v1 = vld [vmem:[%s1035_s0] sm:$0xff]  ;;  %603 = vmatprep.subr.msk.mxu0 %vm47_vm0, %v46_v0  ;;  %653 = vmatprep.subr.msk.mxu1 %vm47_vm0, %v46_v0  ;;  %v31_v4 = vld [vmem:[%s1035_s0 + $0x88] sm:$0xff]  ;;  %v32_v6 = vld [vmem:[%s1035_s0 + $0x90] sm:$0xff] }
   0x3   :  { %v30_v2 = vld [vmem:[%s1035_s0 + $0x80] sm:$0xff]  ;;  %604 = vmatpush3.xpose.msk.msra.mxu0 %vm47_vm0, %v46_v0  ;;  %654 = vmatpush3.xpose.msk.msra.mxu1 %vm47_vm0, %v46_v0  ;;  %v17_v7 = vld [vmem:[%s1035_s0 + $0x18] sm:$0xff]  ;;  %v19_v11 = vld [vmem:[%s1035_s0 + $0x28] sm:$0xff] }
   0x4   :  { %605 = vmatprep.mubr.msk.f32.mxu0 %vm47_vm0, %v14_v1  ;;  %629 = vmatprep.mubr.msk.f32.mxu1 %vm47_vm0, %v30_v2  ;;  %v33_v8 = vld [vmem:[%s1035_s0 + $0x98] sm:$0xff]  ;;  %v18_v9 = vld [vmem:[%s1035_s0 + $0x20] sm:$0xff]  ;;  %v35_v12 = vld [vmem:[%s1035_s0 + $0xa8] sm:$0xff] }
   0x5   :  { %v34_v10 = vld [vmem:[%s1035_s0 + $0xa0] sm:$0xff]  ;;  %v20_v13 = vld [vmem:[%s1035_s0 + $0x30] sm:$0xff]  ;;  %v21_v15 = vld [vmem:[%s1035_s0 + $0x38] sm:$0xff] }
   0x6   :  { %606 = vmatmul.mubr.msk.f32.vlgmr.msra.gmra.mxu0 %vm47_vm0, %v15_v3  ;;  %630 = vmatmul.mubr.msk.f32.vlgmr.msra.gmra.mxu1 %vm47_vm0, %v31_v4  ;;  %v36_v14 = vld [vmem:[%s1035_s0 + $0xb0] sm:$0xff]  ;;  %v37_v16 = vld [vmem:[%s1035_s0 + $0xb8] sm:$0xff]  ;;  %v22_v17 = vld [vmem:[%s1035_s0 + $0x40] sm:$0xff] }
   0x7   :  { %608 = vmatprep.mubr.msk.f32.mxu0 %vm47_vm0, %v16_v5  ;;  %632 = vmatprep.mubr.msk.f32.mxu1 %vm47_vm0, %v32_v6  ;;  %v38_v18 = vld [vmem:[%s1035_s0 + $0xc0] sm:$0xff]  ;;  %v23_v19 = vld [vmem:[%s1035_s0 + $0x48] sm:$0xff]  ;;  %v24_v21 = vld [vmem:[%s1035_s0 + $0x50] sm:$0xff] }
   0x8   :  { %v39_v20 = vld [vmem:[%s1035_s0 + $0xc8] sm:$0xff]  ;;  %v40_v22 = vld [vmem:[%s1035_s0 + $0xd0] sm:$0xff]  ;;  %v25_v23 = vld [vmem:[%s1035_s0 + $0x58] sm:$0xff] }
   0x9   :  { %v41_v24 = vld [vmem:[%s1035_s0 + $0xd8] sm:$0xff]  ;;  %v26_v25 = vld [vmem:[%s1035_s0 + $0x60] sm:$0xff]  ;;  %v27_v27 = vld [vmem:[%s1035_s0 + $0x68] sm:$0xff] }
   0xa   :  { %609 = vmatmul.mubr.msk.f32.gmra.mxu0 %vm47_vm0, %v17_v7  ;;  %633 = vmatmul.mubr.msk.f32.gmra.mxu1 %vm47_vm0, %v33_v8  ;;  %v42_v26 = vld [vmem:[%s1035_s0 + $0xe0] sm:$0xff]  ;;  %v43_v28 = vld [vmem:[%s1035_s0 + $0xe8] sm:$0xff]  ;;  %v28_v29 = vld [vmem:[%s1035_s0 + $0x70] sm:$0xff] }
   0xb   :  { %611 = vmatprep.mubr.msk.f32.mxu0 %vm47_vm0, %v18_v9  ;;  %635 = vmatprep.mubr.msk.f32.mxu1 %vm47_vm0, %v34_v10  ;;  %v44_v30 = vld [vmem:[%s1035_s0 + $0xf0] sm:$0xff]  ;;  %v29_v31 = vld [vmem:[%s1035_s0 + $0x78] sm:$0xff]  ;;  %v405_v33 = vld [vmem:[%s1036_s2 + $0x8] sm:$0xff] }
   0xc   :  { %v45_v32 = vld [vmem:[%s1035_s0 + $0xf8] sm:$0xff]  ;;  %v421_v34 = vld [vmem:[%s1036_s2 + $0x88] sm:$0xff]  ;;  %v404_v35 = vld [vmem:[%s1036_s2] sm:$0xff]  ;;  %v437_v37 = vmul.f32 0.1, %v405_v33 }
   0xd   :  { %v420_v36 = vld [vmem:[%s1036_s2 + $0x80] sm:$0xff]  ;;  %v453_v38 = vmul.f32 0.1, %v421_v34  ;;  %v407_v39 = vld [vmem:[%s1036_s2 + $0x18] sm:$0xff]  ;;  %v436_v43 = vmul.f32 0.1, %v404_v35 }
   0xe   :  { %612 = vmatmul.mubr.msk.f32.gmra.mxu0 %vm47_vm0, %v19_v11  ;;  %636 = vmatmul.mubr.msk.f32.gmra.mxu1 %vm47_vm0, %v35_v12  ;;  %v423_v40 = vld [vmem:[%s1036_s2 + $0x98] sm:$0xff]  ;;  %v452_v44 = vmul.f32 0.1, %v420_v36  ;;  %v406_v47 = vld [vmem:[%s1036_s2 + $0x10] sm:$0xff]  ;;  %v439_v51 = vmul.f32 0.1, %v407_v39 }
   0xf   :  { %614 = vmatprep.mubr.msk.f32.mxu0 %vm47_vm0, %v20_v13  ;;  %638 = vmatprep.mubr.msk.f32.mxu1 %vm47_vm0, %v36_v14  ;;  %v422_v48 = vld [vmem:[%s1036_s2 + $0x90] sm:$0xff]  ;;  %v455_v52 = vmul.f32 0.1, %v423_v40  ;;  %v409_v57 = vld [vmem:[%s1036_s2 + $0x28] sm:$0xff]  ;;  %v438_v61 = vmul.f32 0.1, %v406_v47 }
  0x10   :  { %v425_v58 = vld [vmem:[%s1036_s2 + $0xa8] sm:$0xff]  ;;  %v454_v62 = vmul.f32 0.1, %v422_v48  ;;  %v408_v3 = vld [vmem:[%s1036_s2 + $0x20] sm:$0xff]  ;;  %v441_v7 = vmul.f32 0.1, %v409_v57 }
  0x11   :  { %v424_v4 = vld [vmem:[%s1036_s2 + $0xa0] sm:$0xff]  ;;  %v457_v8 = vmul.f32 0.1, %v425_v58  ;;  %v411_v13 = vld [vmem:[%s1036_s2 + $0x38] sm:$0xff]  ;;  %v413_v33 = vld [vmem:[%s1036_s2 + $0x48] sm:$0xff] }
  0x12   :  { %615 = vmatmul.mubr.msk.f32.gmra.mxu0 %vm47_vm0, %v21_v15  ;;  %639 = vmatmul.mubr.msk.f32.gmra.mxu1 %vm47_vm0, %v37_v16  ;;  %v427_v14 = vld [vmem:[%s1036_s2 + $0xb8] sm:$0xff]  ;;  %v429_v34 = vld [vmem:[%s1036_s2 + $0xc8] sm:$0xff]  ;;  %v445_v47 = vmul.f32 0.1, %v413_v33 }
  0x13   :  { %617 = vmatprep.mubr.msk.f32.mxu0 %vm47_vm0, %v22_v17  ;;  %641 = vmatprep.mubr.msk.f32.mxu1 %vm47_vm0, %v38_v18  ;;  %v440_v17 = vmul.f32 0.1, %v408_v3  ;;  %v456_v18 = vmul.f32 0.1, %v424_v4  ;;  %v461_v48 = vmul.f32 0.1, %v429_v34 }
  0x16   :  { %618 = vmatmul.mubr.msk.f32.gmra.mxu0 %vm47_vm0, %v23_v19  ;;  %642 = vmatmul.mubr.msk.f32.gmra.mxu1 %vm47_vm0, %v39_v20 }
  0x17   :  { %620 = vmatprep.mubr.msk.f32.mxu0 %vm47_vm0, %v24_v21  ;;  %644 = vmatprep.mubr.msk.f32.mxu1 %vm47_vm0, %v40_v22 }
  0x1a   :  { %621 = vmatmul.mubr.msk.f32.gmra.mxu0 %vm47_vm0, %v25_v23  ;;  %645 = vmatmul.mubr.msk.f32.gmra.mxu1 %vm47_vm0, %v41_v24  ;;  %v410_v23 = vld [vmem:[%s1036_s2 + $0x30] sm:$0xff] }
  0x1b   :  { %623 = vmatprep.mubr.msk.f32.mxu0 %vm47_vm0, %v26_v25  ;;  %647 = vmatprep.mubr.msk.f32.mxu1 %vm47_vm0, %v42_v26  ;;  %v426_v24 = vld [vmem:[%s1036_s2 + $0xb0] sm:$0xff] }
  0x1e   :  { %624 = vmatmul.mubr.msk.f32.gmra.mxu0 %vm47_vm0, %v27_v27  ;;  %648 = vmatmul.mubr.msk.f32.gmra.mxu1 %vm47_vm0, %v43_v28  ;;  %v443_v27 = vmul.f32 0.1, %v411_v13  ;;  %v459_v28 = vmul.f32 0.1, %v427_v14 }
  0x1f   :  { %626 = vmatprep.mubr.msk.f32.mxu0 %vm47_vm0, %v28_v29  ;;  %650 = vmatprep.mubr.msk.f32.mxu1 %vm47_vm0, %v44_v30 }
  0x22   :  { %627 = vmatmul.mubr.msk.f32.gmra.mxu0 %vm47_vm0, %v29_v31  ;;  %651 = vmatmul.mubr.msk.f32.gmra.mxu1 %vm47_vm0, %v45_v32 }
  0xc6   :  { %v607_v41 = vpop.f32.mrf.mxu0  ;;  %v631_v42 = vpop.f32.mrf.mxu1 }
  0xc7   :  { %v373_v45 = vmul.f32 0.9, %v607_v41  ;;  %v389_v46 = vmul.f32 0.9, %v631_v42 }
  0xc8   :  { %v213_v49 = vpop.f32.mrf.mxu0  ;;  %v293_v50 = vpop.f32.mrf.mxu1 }
  0xc9   :  { %v469_v53 = vadd.f32 %v437_v37, %v373_v45  ;;  %v485_v54 = vadd.f32 %v453_v38, %v389_v46  ;;  %v372_v55 = vmul.f32 0.9, %v213_v49  ;;  %v388_v56 = vmul.f32 0.9, %v293_v50 }
  0xca   :  { %v610_v59 = vpop.f32.mrf.mxu0  ;;  %v634_v60 = vpop.f32.mrf.mxu1  ;;  %v442_v37 = vmul.f32 0.1, %v410_v23  ;;  %v458_v38 = vmul.f32 0.1, %v426_v24 }
  0xcb   :  { %502 = vst.msk [vmem:[%s1037_s3 + $0x8] sm:$0xff] %vm500_vm1, %v469_v53  ;;  %518 = vst.msk [vmem:[%s1037_s3 + $0x88] sm:$0xff] %vm500_vm1, %v485_v54  ;;  %v468_v63 = vadd.f32 %v436_v43, %v372_v55  ;;  %v484_v0 = vadd.f32 %v452_v44, %v388_v56  ;;  %v375_v1 = vmul.f32 0.9, %v610_v59  ;;  %v391_v2 = vmul.f32 0.9, %v634_v60 }
  0xcc   :  { %v223_v5 = vpop.f32.mrf.mxu0  ;;  %v303_v6 = vpop.f32.mrf.mxu1  ;;  %v412_v43 = vld [vmem:[%s1036_s2 + $0x40] sm:$0xff]  ;;  %v415_v53 = vld [vmem:[%s1036_s2 + $0x58] sm:$0xff] }
  0xcd   :  { %501 = vst.msk [vmem:[%s1037_s3] sm:$0xff] %vm500_vm1, %v468_v63  ;;  %517 = vst.msk [vmem:[%s1037_s3 + $0x80] sm:$0xff] %vm500_vm1, %v484_v0  ;;  %v471_v9 = vadd.f32 %v439_v51, %v375_v1  ;;  %v487_v10 = vadd.f32 %v455_v52, %v391_v2  ;;  %v374_v11 = vmul.f32 0.9, %v223_v5  ;;  %v390_v12 = vmul.f32 0.9, %v303_v6 }
  0xce   :  { %v613_v15 = vpop.f32.mrf.mxu0  ;;  %v637_v16 = vpop.f32.mrf.mxu1  ;;  %v428_v44 = vld [vmem:[%s1036_s2 + $0xc0] sm:$0xff]  ;;  %v431_v54 = vld [vmem:[%s1036_s2 + $0xd8] sm:$0xff]  ;;  %v444_v57 = vmul.f32 0.1, %v412_v43  ;;  %v414_v63 = vld [vmem:[%s1036_s2 + $0x50] sm:$0xff] }
  0xcf   :  { %504 = vst.msk [vmem:[%s1037_s3 + $0x18] sm:$0xff] %vm500_vm1, %v471_v9  ;;  %520 = vst.msk [vmem:[%s1037_s3 + $0x98] sm:$0xff] %vm500_vm1, %v487_v10  ;;  %v470_v19 = vadd.f32 %v438_v61, %v374_v11  ;;  %v486_v20 = vadd.f32 %v454_v62, %v390_v12  ;;  %v377_v21 = vmul.f32 0.9, %v613_v15  ;;  %v393_v22 = vmul.f32 0.9, %v637_v16 }
  0xd0   :  { %v233_v25 = vpop.f32.mrf.mxu0  ;;  %v313_v26 = vpop.f32.mrf.mxu1  ;;  %v460_v58 = vmul.f32 0.1, %v428_v44  ;;  %v430_v0 = vld [vmem:[%s1036_s2 + $0xd0] sm:$0xff]  ;;  %v447_v3 = vmul.f32 0.1, %v415_v53  ;;  %v417_v9 = vld [vmem:[%s1036_s2 + $0x68] sm:$0xff] }
  0xd1   :  { %503 = vst.msk [vmem:[%s1037_s3 + $0x10] sm:$0xff] %vm500_vm1, %v470_v19  ;;  %519 = vst.msk [vmem:[%s1037_s3 + $0x90] sm:$0xff] %vm500_vm1, %v486_v20  ;;  %v473_v29 = vadd.f32 %v441_v7, %v377_v21  ;;  %v489_v30 = vadd.f32 %v457_v8, %v393_v22  ;;  %v376_v31 = vmul.f32 0.9, %v233_v25  ;;  %v392_v32 = vmul.f32 0.9, %v313_v26 }
  0xd2   :  { %v616_v35 = vpop.f32.mrf.mxu0  ;;  %v640_v36 = vpop.f32.mrf.mxu1  ;;  %v463_v4 = vmul.f32 0.1, %v431_v54  ;;  %v433_v10 = vld [vmem:[%s1036_s2 + $0xe8] sm:$0xff]  ;;  %v446_v13 = vmul.f32 0.1, %v414_v63  ;;  %v416_v19 = vld [vmem:[%s1036_s2 + $0x60] sm:$0xff] }
  0xd3   :  { %506 = vst.msk [vmem:[%s1037_s3 + $0x28] sm:$0xff] %vm500_vm1, %v473_v29  ;;  %522 = vst.msk [vmem:[%s1037_s3 + $0xa8] sm:$0xff] %vm500_vm1, %v489_v30  ;;  %v472_v39 = vadd.f32 %v440_v17, %v376_v31  ;;  %v488_v40 = vadd.f32 %v456_v18, %v392_v32  ;;  %v379_v41 = vmul.f32 0.9, %v616_v35  ;;  %v395_v42 = vmul.f32 0.9, %v640_v36 }
  0xd4   :  { %v243_v45 = vpop.f32.mrf.mxu0  ;;  %v323_v46 = vpop.f32.mrf.mxu1  ;;  %v462_v14 = vmul.f32 0.1, %v430_v0  ;;  %v432_v20 = vld [vmem:[%s1036_s2 + $0xe0] sm:$0xff]  ;;  %v449_v23 = vmul.f32 0.1, %v417_v9  ;;  %v419_v29 = vld [vmem:[%s1036_s2 + $0x78] sm:$0xff] }
  0xd5   :  { %505 = vst.msk [vmem:[%s1037_s3 + $0x20] sm:$0xff] %vm500_vm1, %v472_v39  ;;  %521 = vst.msk [vmem:[%s1037_s3 + $0xa0] sm:$0xff] %vm500_vm1, %v488_v40  ;;  %v475_v49 = vadd.f32 %v443_v27, %v379_v41  ;;  %v491_v50 = vadd.f32 %v459_v28, %v395_v42  ;;  %v378_v51 = vmul.f32 0.9, %v243_v45  ;;  %v394_v52 = vmul.f32 0.9, %v323_v46 }
  0xd6   :  { %v619_v55 = vpop.f32.mrf.mxu0  ;;  %v643_v56 = vpop.f32.mrf.mxu1  ;;  %v465_v24 = vmul.f32 0.1, %v433_v10  ;;  %v435_v30 = vld [vmem:[%s1036_s2 + $0xf8] sm:$0xff]  ;;  %v448_v33 = vmul.f32 0.1, %v416_v19  ;;  %v418_v39 = vld [vmem:[%s1036_s2 + $0x70] sm:$0xff] }
  0xd7   :  { %508 = vst.msk [vmem:[%s1037_s3 + $0x38] sm:$0xff] %vm500_vm1, %v475_v49  ;;  %524 = vst.msk [vmem:[%s1037_s3 + $0xb8] sm:$0xff] %vm500_vm1, %v491_v50  ;;  %v474_v59 = vadd.f32 %v442_v37, %v378_v51  ;;  %v490_v60 = vadd.f32 %v458_v38, %v394_v52  ;;  %v381_v61 = vmul.f32 0.9, %v619_v55  ;;  %v397_v62 = vmul.f32 0.9, %v643_v56 }
  0xd8   :  { %v253_v1 = vpop.f32.mrf.mxu0  ;;  %v333_v2 = vpop.f32.mrf.mxu1  ;;  %v464_v34 = vmul.f32 0.1, %v432_v20  ;;  %v434_v40 = vld [vmem:[%s1036_s2 + $0xf0] sm:$0xff]  ;;  %v451_v43 = vmul.f32 0.1, %v419_v29 }
  0xd9   :  { %507 = vst.msk [vmem:[%s1037_s3 + $0x30] sm:$0xff] %vm500_vm1, %v474_v59  ;;  %523 = vst.msk [vmem:[%s1037_s3 + $0xb0] sm:$0xff] %vm500_vm1, %v490_v60  ;;  %v477_v5 = vadd.f32 %v445_v47, %v381_v61  ;;  %v493_v6 = vadd.f32 %v461_v48, %v397_v62  ;;  %v380_v7 = vmul.f32 0.9, %v253_v1  ;;  %v396_v8 = vmul.f32 0.9, %v333_v2 }
  0xda   :  { %v622_v11 = vpop.f32.mrf.mxu0  ;;  %v646_v12 = vpop.f32.mrf.mxu1  ;;  %v467_v44 = vmul.f32 0.1, %v435_v30  ;;  %v450_v51 = vmul.f32 0.1, %v418_v39  ;;  %v466_v52 = vmul.f32 0.1, %v434_v40 }
  0xdb   :  { %510 = vst.msk [vmem:[%s1037_s3 + $0x48] sm:$0xff] %vm500_vm1, %v477_v5  ;;  %526 = vst.msk [vmem:[%s1037_s3 + $0xc8] sm:$0xff] %vm500_vm1, %v493_v6  ;;  %v476_v15 = vadd.f32 %v444_v57, %v380_v7  ;;  %v492_v16 = vadd.f32 %v460_v58, %v396_v8  ;;  %v383_v17 = vmul.f32 0.9, %v622_v11  ;;  %v399_v18 = vmul.f32 0.9, %v646_v12 }
  0xdc   :  { %v263_v21 = vpop.f32.mrf.mxu0  ;;  %v343_v22 = vpop.f32.mrf.mxu1 }
  0xdd   :  { %509 = vst.msk [vmem:[%s1037_s3 + $0x40] sm:$0xff] %vm500_vm1, %v476_v15  ;;  %525 = vst.msk [vmem:[%s1037_s3 + $0xc0] sm:$0xff] %vm500_vm1, %v492_v16  ;;  %v479_v25 = vadd.f32 %v447_v3, %v383_v17  ;;  %v495_v26 = vadd.f32 %v463_v4, %v399_v18  ;;  %v382_v27 = vmul.f32 0.9, %v263_v21  ;;  %v398_v28 = vmul.f32 0.9, %v343_v22 }
  0xde   :  { %v625_v31 = vpop.f32.mrf.mxu0  ;;  %v649_v32 = vpop.f32.mrf.mxu1 }
  0xdf   :  { %512 = vst.msk [vmem:[%s1037_s3 + $0x58] sm:$0xff] %vm500_vm1, %v479_v25  ;;  %528 = vst.msk [vmem:[%s1037_s3 + $0xd8] sm:$0xff] %vm500_vm1, %v495_v26  ;;  %v478_v35 = vadd.f32 %v446_v13, %v382_v27  ;;  %v494_v36 = vadd.f32 %v462_v14, %v398_v28  ;;  %v385_v37 = vmul.f32 0.9, %v625_v31  ;;  %v401_v38 = vmul.f32 0.9, %v649_v32 }
  0xe0   :  { %v273_v41 = vpop.f32.mrf.mxu0  ;;  %v353_v42 = vpop.f32.mrf.mxu1 }
  0xe1   :  { %511 = vst.msk [vmem:[%s1037_s3 + $0x50] sm:$0xff] %vm500_vm1, %v478_v35  ;;  %527 = vst.msk [vmem:[%s1037_s3 + $0xd0] sm:$0xff] %vm500_vm1, %v494_v36  ;;  %v481_v45 = vadd.f32 %v449_v23, %v385_v37  ;;  %v497_v46 = vadd.f32 %v465_v24, %v401_v38  ;;  %v384_v47 = vmul.f32 0.9, %v273_v41  ;;  %v400_v48 = vmul.f32 0.9, %v353_v42 }
  0xe2   :  { %v628_v49 = vpop.f32.mrf.mxu0  ;;  %v652_v50 = vpop.f32.mrf.mxu1 }
  0xe3   :  { %514 = vst.msk [vmem:[%s1037_s3 + $0x68] sm:$0xff] %vm500_vm1, %v481_v45  ;;  %530 = vst.msk [vmem:[%s1037_s3 + $0xe8] sm:$0xff] %vm500_vm1, %v497_v46  ;;  %v480_v53 = vadd.f32 %v448_v33, %v384_v47  ;;  %v496_v54 = vadd.f32 %v464_v34, %v400_v48  ;;  %v387_v55 = vmul.f32 0.9, %v628_v49  ;;  %v403_v56 = vmul.f32 0.9, %v652_v50 }
  0xe4   :  { %v283_v57 = vpop.f32.mrf.mxu0  ;;  %v363_v58 = vpop.f32.mrf.mxu1 }
  0xe5   :  { %513 = vst.msk [vmem:[%s1037_s3 + $0x60] sm:$0xff] %vm500_vm1, %v480_v53  ;;  %529 = vst.msk [vmem:[%s1037_s3 + $0xe0] sm:$0xff] %vm500_vm1, %v496_v54  ;;  %v483_v59 = vadd.f32 %v451_v43, %v387_v55  ;;  %v499_v60 = vadd.f32 %v467_v44, %v403_v56  ;;  %v386_v61 = vmul.f32 0.9, %v283_v57  ;;  %v402_v62 = vmul.f32 0.9, %v363_v58 }
  0xe7   :  { %516 = vst.msk [vmem:[%s1037_s3 + $0x78] sm:$0xff] %vm500_vm1, %v483_v59  ;;  %532 = vst.msk [vmem:[%s1037_s3 + $0xf8] sm:$0xff] %vm500_vm1, %v499_v60  ;;  %v482_v63 = vadd.f32 %v450_v51, %v386_v61  ;;  %v498_v0 = vadd.f32 %v466_v52, %v402_v62 }
  0xe9   :  { %515 = vst.msk [vmem:[%s1037_s3 + $0x70] sm:$0xff] %vm500_vm1, %v482_v63  ;;  %531 = vst.msk [vmem:[%s1037_s3 + $0xf0] sm:$0xff] %vm500_vm1, %v498_v0 }

</bundles_post_ra>
